<compile_context>
chip_gen: v7x
topology: tpu7x:2x2x1
jax: 0.10.0
libtpu: 0.0.40
codegen_flags: <defaults>
</compile_context>

<pallas_src>
import functools

import jax
import jax.numpy as jnp
from jax.experimental import pallas as pl
from jax.experimental.pallas import tpu as pltpu

W_DICE = 0.5
W_BCE = 0.5
SMOOTH_NR = 1e-5  # MONAI DiceLoss defaults
SMOOTH_DR = 1e-5

_MAX_TILE_R = 256   # multiple of 32 -> legal sublane tiling for f32/bf16/i8
_LANES = 128


def _sublane_multiple(dtype):
    # minimal second-to-last tiling multiple by element width (f32:8, bf16:16, i8:32)
    itemsize = jnp.dtype(dtype).itemsize
    return {1: 32, 2: 16, 4: 8}.get(itemsize, 8)


def _tile_caps():
    """(max spatial tile, vmem limit bytes) per TPU generation."""
    try:
        kind = jax.devices()[0].device_kind.lower()
    except Exception:
        kind = ""
    if "v5" in kind or "v6" in kind:        # 128 MiB physical VMEM: big tiles are free
        return 8192, 64 * 1024 * 1024
    return 4096, 32 * 1024 * 1024            # v7x (64 MiB VMEM) / unknown / interpret


def _dice_bce_kernel(pred_ref, label_ref, dice_ref, bce_ref,
                     inter_acc, po_acc, go_acc, bce_acc,
                     *, R, S, tile_r, tile_s, n_i, n_k, acc_w):
    # pred_ref/label_ref: (tile_r, tile_s) VMEM tiles.
    # dice_ref/bce_ref:   (tile_r, 1) per-row outputs (resident across k).
    # *_acc:              (tile_r, acc_w) f32 lane-dense accumulators.
    #
    # NOTE: pl.program_id is only called at the top level of the body (never
    # inside a pl.when closure) so the kernel also lowers under interpret mode.
    i = pl.program_id(0)
    k = pl.program_id(1)

    @pl.when(k == 0)
    def _init():
        inter_acc[...] = jnp.zeros_like(inter_acc)
        po_acc[...] = jnp.zeros_like(po_acc)
        go_acc[...] = jnp.zeros_like(go_acc)
        bce_acc[...] = jnp.zeros_like(bce_acc)

    x = pred_ref[...].astype(jnp.float32)
    y = label_ref[...].astype(jnp.float32)   # label cast happens in-kernel

    # One exp per element: derive both the (exact) sigmoid and the stable
    # BCEWithLogits element value from e = exp(-|x|).
    e = jnp.exp(-jnp.abs(x))
    inv = 1.0 / (1.0 + e)
    p = jnp.where(x >= 0.0, inv, e * inv)                # sigmoid(x)
    bce = jnp.maximum(x, 0.0) - x * y + jnp.log1p(e)     # BCE-with-logits element

    def lane_sum(v):
        # (tile_r, tile_s) -> (tile_r, acc_w) per-lane partial sums.
        # 128-aligned static slices -> pure full-width VALU adds, no relayout.
        if acc_w == 1:
            return jnp.sum(v, axis=-1, keepdims=True)
        out = v[:, 0:_LANES]
        for s0 in range(_LANES, tile_s, _LANES):
            out = out + v[:, s0:s0 + _LANES]
        return out

    def accumulate(pv, yv, bv):
        inter_acc[...] += lane_sum(pv * yv)
        po_acc[...] += lane_sum(pv)
        go_acc[...] += lane_sum(yv)
        bce_acc[...] += lane_sum(bv)

    row_edge = (R % tile_r) != 0    # static Python bools
    col_edge = (S % tile_s) != 0

    if row_edge or col_edge:
        conds = []
        if row_edge:
            conds.append(i == n_i - 1)
        if col_edge:
            conds.append(k == n_k - 1)
        is_edge = conds[0] if len(conds) == 1 else jnp.logical_or(conds[0], conds[1])

        @pl.when(is_edge)
        def _edge():
            # Out-of-bounds rows/lanes of the edge block hold undefined data and
            # must not contribute; mask with cheap (tile_r,1)/(1,tile_s) iotas.
            valid = None
            if row_edge:
                rid = i * tile_r + jax.lax.broadcasted_iota(jnp.int32, (tile_r, 1), 0)
                valid = rid < R
            if col_edge:
                cid = k * tile_s + jax.lax.broadcasted_iota(jnp.int32, (1, tile_s), 1)
                cvalid = cid < S
                valid = cvalid if valid is None else jnp.logical_and(valid, cvalid)
            accumulate(jnp.where(valid, p, 0.0),
                       jnp.where(valid, y, 0.0),
                       jnp.where(valid, bce, 0.0))

        @pl.when(jnp.logical_not(is_edge))
        def _interior():
            accumulate(p, y, bce)
    else:
        accumulate(p, y, bce)

    @pl.when(k == n_k - 1)
    def _finalize():
        # Single cross-lane (XLU) reduce per row tile.
        inter = jnp.sum(inter_acc[...], axis=-1, keepdims=True)
        po = jnp.sum(po_acc[...], axis=-1, keepdims=True)
        go = jnp.sum(go_acc[...], axis=-1, keepdims=True)
        dice_ref[...] = 1.0 - (2.0 * inter + SMOOTH_NR) / (po + go + SMOOTH_DR)
        bce_ref[...] = jnp.sum(bce_acc[...], axis=-1, keepdims=True)


def dice_bce_multilabel_loss(pred, label, w_dice=W_DICE, w_bce=W_BCE):
    """pred, label: (B, C, H, W). Label may be any dtype (cast inside the kernel).
    Returns scalar float32 loss = w_dice * dice + w_bce * bce."""
    B, C, H, W = pred.shape
    R, S = B * C, H * W
    pred2 = pred.reshape(R, S)
    label2 = label.reshape(R, S)          # keep narrow dtype -> less HBM traffic

    sub = max(_sublane_multiple(pred2.dtype), _sublane_multiple(label2.dtype))
    max_s, vmem_limit = _tile_caps()

    # No wrapper-side padding: blocks either divide (sub,128)-aligned or equal
    # the full array dim; Pallas handles the partial edge blocks + we mask them.
    tile_s = S if S <= max_s else max_s                 # max_s % 128 == 0
    tile_r = R if R <= _MAX_TILE_R else _MAX_TILE_R
    n_i = pl.cdiv(R, tile_r)
    n_k = pl.cdiv(S, tile_s)

    # v7x megacore: give the "parallel" row axis >= 2 blocks when that keeps the
    # block a legal sublane multiple (no-op on v5e/v6e).
    while n_i < 2 and tile_r % (2 * sub) == 0:
        tile_r //= 2
        n_i = pl.cdiv(R, tile_r)

    acc_w = _LANES if tile_s % _LANES == 0 else 1       # lane-dense accumulators

    kernel = functools.partial(
        _dice_bce_kernel, R=R, S=S, tile_r=tile_r, tile_s=tile_s,
        n_i=n_i, n_k=n_k, acc_w=acc_w)

    dice_rows, bce_rows = pl.pallas_call(
        kernel,
        out_shape=(jax.ShapeDtypeStruct((R, 1), jnp.float32),
                   jax.ShapeDtypeStruct((R, 1), jnp.float32)),
        grid_spec=pltpu.PrefetchScalarGridSpec(
            num_scalar_prefetch=0,
            grid=(n_i, n_k),
            in_specs=[pl.BlockSpec((tile_r, tile_s), lambda i, k: (i, k)),
                      pl.BlockSpec((tile_r, tile_s), lambda i, k: (i, k))],
            out_specs=[pl.BlockSpec((tile_r, 1), lambda i, k: (i, 0)),
                       pl.BlockSpec((tile_r, 1), lambda i, k: (i, 0))],
            scratch_shapes=[pltpu.VMEM((tile_r, acc_w), jnp.float32)] * 4,
        ),
        compiler_params=pltpu.CompilerParams(
            dimension_semantics=("parallel", "arbitrary"),
            vmem_limit_bytes=vmem_limit,
        ),
    )(pred2, label2)

    # Tiny final reduction + combine (outside the kernel: safe under megacore).
    dice_loss = jnp.sum(dice_rows) / R
    bce_loss = jnp.sum(bce_rows) / (R * S)
    return w_dice * dice_loss + w_bce * bce_loss


if __name__ == "__main__":
    key = jax.random.PRNGKey(0)
    k_pred, k_lbl = jax.random.split(key)

    B, C, H, W = 2, 4, 16, 16
    pred = jax.random.normal(k_pred, (B, C, H, W), dtype=jnp.float32)
    # int8 {0,1} labels: 1 byte/elem over HBM; cast to f32 happens in-kernel.
    label = (jax.random.uniform(k_lbl, (B, C, H, W)) > 0.5).astype(jnp.int8)

    loss = dice_bce_multilabel_loss(pred, label)
    jax.block_until_ready(loss)

    # Pure-JAX reference of the PyTorch module's forward (sanity check).
    x = pred.reshape(B * C, H * W).astype(jnp.float32)
    y = label.reshape(B * C, H * W).astype(jnp.float32)
    p = jax.nn.sigmoid(x)
    dice_ref = jnp.mean(1.0 - (2.0 * jnp.sum(p * y, -1) + SMOOTH_NR)
                        / (jnp.sum(p, -1) + jnp.sum(y, -1) + SMOOTH_DR))
    bce_ref = jnp.mean(jnp.maximum(x, 0.0) - x * y + jnp.log1p(jnp.exp(-jnp.abs(x))))
    ref = W_DICE * dice_ref + W_BCE * bce_ref

    assert jnp.allclose(loss, ref, rtol=1e-4, atol=1e-5), (float(loss), float(ref))
    print("KERNEL_OK")
</pallas_src>

<mosaic_0001>
module attributes {stable_mosaic.version = 11 : i64} {
  func.func @_dice_bce_kernel(%arg0: i32, %arg1: i32, %arg2: memref<8x256xf32, #tpu.memory_space<vmem>>, %arg3: memref<8x256xi8, #tpu.memory_space<vmem>>, %arg4: memref<8x1xf32, #tpu.memory_space<vmem>>, %arg5: memref<8x1xf32, #tpu.memory_space<vmem>>, %arg6: memref<8x128xf32, #tpu.memory_space<vmem>>, %arg7: memref<8x128xf32, #tpu.memory_space<vmem>>, %arg8: memref<8x128xf32, #tpu.memory_space<vmem>>, %arg9: memref<8x128xf32, #tpu.memory_space<vmem>>) attributes {dimension_semantics = [#tpu.dimension_semantics<parallel>, #tpu.dimension_semantics<arbitrary>], iteration_bounds = array<i64: 1, 1>, scalar_prefetch = 0 : i64, scratch_operands = 4 : i64, tpu.core_type = #tpu.core_type<tc>, window_params = [{transform_indices = @transform_0, window_bounds = array<i64: 8, 256>}, {transform_indices = @transform_1, window_bounds = array<i64: 8, 256>}, {transform_indices = @transform_2, window_bounds = array<i64: 8, 1>}, {transform_indices = @transform_3, window_bounds = array<i64: 8, 1>}]} {
    %c0_i32 = arith.constant 0 : i32
    %0 = arith.cmpi eq, %arg1, %c0_i32 : i32
    %1 = arith.extui %0 : i1 to i32
    %c0_i32_0 = arith.constant 0 : i32
    %2 = arith.cmpi ne, %1, %c0_i32_0 : i32
    scf.if %2 {
      %cst_26 = arith.constant 0.000000e+00 : f32
      %52 = vector.broadcast %cst_26 : f32 to vector<8x128xf32>
      %c0_27 = arith.constant 0 : index
      %c0_28 = arith.constant 0 : index
      %53 = vector.load %arg6[%c0_27, %c0_28] : memref<8x128xf32, #tpu.memory_space<vmem>>, vector<8x128xf32>
      tpu.vector_store %arg6[%c0_27, %c0_28], %52 {strides = array<i32>} : memref<8x128xf32, #tpu.memory_space<vmem>>, vector<8x128xf32>,
      %cst_29 = arith.constant 0.000000e+00 : f32
      %54 = vector.broadcast %cst_29 : f32 to vector<8x128xf32>
      %c0_30 = arith.constant 0 : index
      %c0_31 = arith.constant 0 : index
      %55 = vector.load %arg7[%c0_30, %c0_31] : memref<8x128xf32, #tpu.memory_space<vmem>>, vector<8x128xf32>
      tpu.vector_store %arg7[%c0_30, %c0_31], %54 {strides = array<i32>} : memref<8x128xf32, #tpu.memory_space<vmem>>, vector<8x128xf32>,
      %cst_32 = arith.constant 0.000000e+00 : f32
      %56 = vector.broadcast %cst_32 : f32 to vector<8x128xf32>
      %c0_33 = arith.constant 0 : index
      %c0_34 = arith.constant 0 : index
      %57 = vector.load %arg8[%c0_33, %c0_34] : memref<8x128xf32, #tpu.memory_space<vmem>>, vector<8x128xf32>
      tpu.vector_store %arg8[%c0_33, %c0_34], %56 {strides = array<i32>} : memref<8x128xf32, #tpu.memory_space<vmem>>, vector<8x128xf32>,
      %cst_35 = arith.constant 0.000000e+00 : f32
      %58 = vector.broadcast %cst_35 : f32 to vector<8x128xf32>
      %c0_36 = arith.constant 0 : index
      %c0_37 = arith.constant 0 : index
      %59 = vector.load %arg9[%c0_36, %c0_37] : memref<8x128xf32, #tpu.memory_space<vmem>>, vector<8x128xf32>
      tpu.vector_store %arg9[%c0_36, %c0_37], %58 {strides = array<i32>} : memref<8x128xf32, #tpu.memory_space<vmem>>, vector<8x128xf32>,
    } else {
    }
    %c0 = arith.constant 0 : index
    %c0_1 = arith.constant 0 : index
    %3 = vector.load %arg2[%c0, %c0_1] : memref<8x256xf32, #tpu.memory_space<vmem>>, vector<8x256xf32>
    %c0_2 = arith.constant 0 : index
    %c0_3 = arith.constant 0 : index
    %4 = vector.load %arg3[%c0_2, %c0_3] : memref<8x256xi8, #tpu.memory_space<vmem>>, vector<8x256xi8>
    %5 = arith.sitofp %4 : vector<8x256xi8> to vector<8x256xf32>
    %6 = math.absf %3 : vector<8x256xf32>
    %cst = arith.constant 0.000000e+00 : f32
    %7 = vector.broadcast %cst : f32 to vector<8x256xf32>
    %8 = arith.subf %7, %6 : vector<8x256xf32>
    %9 = math.exp %8 : vector<8x256xf32>
    %cst_4 = arith.constant 1.000000e+00 : f32
    %10 = vector.broadcast %cst_4 : f32 to vector<8x256xf32>
    %11 = arith.addf %10, %9 : vector<8x256xf32>
    %cst_5 = arith.constant 1.000000e+00 : f32
    %12 = vector.broadcast %cst_5 : f32 to vector<8x256xf32>
    %13 = arith.divf %12, %11 : vector<8x256xf32>
    %cst_6 = arith.constant 0.000000e+00 : f32
    %14 = vector.broadcast %cst_6 : f32 to vector<8x256xf32>
    %15 = arith.cmpf oge, %3, %14 : vector<8x256xf32>
    %16 = arith.mulf %9, %13 : vector<8x256xf32>
    %17 = arith.select %15, %13, %16 : vector<8x256xi1>, vector<8x256xf32>
    %cst_7 = arith.constant 0.000000e+00 : f32
    %18 = vector.broadcast %cst_7 : f32 to vector<8x256xf32>
    %19 = arith.maximumf %3, %18 : vector<8x256xf32>
    %20 = arith.mulf %3, %5 : vector<8x256xf32>
    %21 = arith.subf %19, %20 : vector<8x256xf32>
    %22 = math.log1p %9 : vector<8x256xf32>
    %23 = arith.addf %21, %22 : vector<8x256xf32>
    %c0_8 = arith.constant 0 : index
    %c0_9 = arith.constant 0 : index
    %24 = vector.load %arg6[%c0_8, %c0_9] : memref<8x128xf32, #tpu.memory_space<vmem>>, vector<8x128xf32>
    %25 = arith.mulf %17, %5 : vector<8x256xf32>
    %26 = vector.extract_strided_slice %25 {offsets = [0, 0], sizes = [8, 128], strides = [1, 1]} : vector<8x256xf32> to vector<8x128xf32>
    %27 = vector.extract_strided_slice %25 {offsets = [0, 128], sizes = [8, 128], strides = [1, 1]} : vector<8x256xf32> to vector<8x128xf32>
    %28 = arith.addf %26, %27 : vector<8x128xf32>
    %29 = arith.addf %24, %28 : vector<8x128xf32>
    %c0_10 = arith.constant 0 : index
    %c0_11 = arith.constant 0 : index
    %30 = vector.load %arg6[%c0_10, %c0_11] : memref<8x128xf32, #tpu.memory_space<vmem>>, vector<8x128xf32>
    tpu.vector_store %arg6[%c0_10, %c0_11], %29 {strides = array<i32>} : memref<8x128xf32, #tpu.memory_space<vmem>>, vector<8x128xf32>,
    %c0_12 = arith.constant 0 : index
    %c0_13 = arith.constant 0 : index
    %31 = vector.load %arg7[%c0_12, %c0_13] : memref<8x128xf32, #tpu.memory_space<vmem>>, vector<8x128xf32>
    %32 = vector.extract_strided_slice %17 {offsets = [0, 0], sizes = [8, 128], strides = [1, 1]} : vector<8x256xf32> to vector<8x128xf32>
    %33 = vector.extract_strided_slice %17 {offsets = [0, 128], sizes = [8, 128], strides = [1, 1]} : vector<8x256xf32> to vector<8x128xf32>
    %34 = arith.addf %32, %33 : vector<8x128xf32>
    %35 = arith.addf %31, %34 : vector<8x128xf32>
    %c0_14 = arith.constant 0 : index
    %c0_15 = arith.constant 0 : index
    %36 = vector.load %arg7[%c0_14, %c0_15] : memref<8x128xf32, #tpu.memory_space<vmem>>, vector<8x128xf32>
    tpu.vector_store %arg7[%c0_14, %c0_15], %35 {strides = array<i32>} : memref<8x128xf32, #tpu.memory_space<vmem>>, vector<8x128xf32>,
    %c0_16 = arith.constant 0 : index
    %c0_17 = arith.constant 0 : index
    %37 = vector.load %arg8[%c0_16, %c0_17] : memref<8x128xf32, #tpu.memory_space<vmem>>, vector<8x128xf32>
    %38 = vector.extract_strided_slice %5 {offsets = [0, 0], sizes = [8, 128], strides = [1, 1]} : vector<8x256xf32> to vector<8x128xf32>
    %39 = vector.extract_strided_slice %5 {offsets = [0, 128], sizes = [8, 128], strides = [1, 1]} : vector<8x256xf32> to vector<8x128xf32>
    %40 = arith.addf %38, %39 : vector<8x128xf32>
    %41 = arith.addf %37, %40 : vector<8x128xf32>
    %c0_18 = arith.constant 0 : index
    %c0_19 = arith.constant 0 : index
    %42 = vector.load %arg8[%c0_18, %c0_19] : memref<8x128xf32, #tpu.memory_space<vmem>>, vector<8x128xf32>
    tpu.vector_store %arg8[%c0_18, %c0_19], %41 {strides = array<i32>} : memref<8x128xf32, #tpu.memory_space<vmem>>, vector<8x128xf32>,
    %c0_20 = arith.constant 0 : index
    %c0_21 = arith.constant 0 : index
    %43 = vector.load %arg9[%c0_20, %c0_21] : memref<8x128xf32, #tpu.memory_space<vmem>>, vector<8x128xf32>
    %44 = vector.extract_strided_slice %23 {offsets = [0, 0], sizes = [8, 128], strides = [1, 1]} : vector<8x256xf32> to vector<8x128xf32>
    %45 = vector.extract_strided_slice %23 {offsets = [0, 128], sizes = [8, 128], strides = [1, 1]} : vector<8x256xf32> to vector<8x128xf32>
    %46 = arith.addf %44, %45 : vector<8x128xf32>
    %47 = arith.addf %43, %46 : vector<8x128xf32>
    %c0_22 = arith.constant 0 : index
    %c0_23 = arith.constant 0 : index
    %48 = vector.load %arg9[%c0_22, %c0_23] : memref<8x128xf32, #tpu.memory_space<vmem>>, vector<8x128xf32>
    tpu.vector_store %arg9[%c0_22, %c0_23], %47 {strides = array<i32>} : memref<8x128xf32, #tpu.memory_space<vmem>>, vector<8x128xf32>,
    %c0_i32_24 = arith.constant 0 : i32
    %49 = arith.cmpi eq, %arg1, %c0_i32_24 : i32
    %50 = arith.extui %49 : i1 to i32
    %c0_i32_25 = arith.constant 0 : i32
    %51 = arith.cmpi ne, %50, %c0_i32_25 : i32
    scf.if %51 {
      %c0_26 = arith.constant 0 : index
      %c0_27 = arith.constant 0 : index
      %52 = vector.load %arg6[%c0_26, %c0_27] : memref<8x128xf32, #tpu.memory_space<vmem>>, vector<8x128xf32>
      %cst_28 = arith.constant dense<0.000000e+00> : vector<8xf32>
      %53 = vector.multi_reduction <add>, %52, %cst_28 [1] : vector<8x128xf32> to vector<8xf32>
      %54 = vector.shape_cast %53 : vector<8xf32> to vector<8x1xf32>
      %c0_29 = arith.constant 0 : index
      %c0_30 = arith.constant 0 : index
      %55 = vector.load %arg7[%c0_29, %c0_30] : memref<8x128xf32, #tpu.memory_space<vmem>>, vector<8x128xf32>
      %cst_31 = arith.constant dense<0.000000e+00> : vector<8xf32>
      %56 = vector.multi_reduction <add>, %55, %cst_31 [1] : vector<8x128xf32> to vector<8xf32>
      %57 = vector.shape_cast %56 : vector<8xf32> to vector<8x1xf32>
      %c0_32 = arith.constant 0 : index
      %c0_33 = arith.constant 0 : index
      %58 = vector.load %arg8[%c0_32, %c0_33] : memref<8x128xf32, #tpu.memory_space<vmem>>, vector<8x128xf32>
      %cst_34 = arith.constant dense<0.000000e+00> : vector<8xf32>
      %59 = vector.multi_reduction <add>, %58, %cst_34 [1] : vector<8x128xf32> to vector<8xf32>
      %60 = vector.shape_cast %59 : vector<8xf32> to vector<8x1xf32>
      %cst_35 = arith.constant 2.000000e+00 : f32
      %61 = vector.broadcast %cst_35 : f32 to vector<8x1xf32>
      %62 = arith.mulf %61, %54 : vector<8x1xf32>
      %cst_36 = arith.constant 9.99999974E-6 : f32
      %63 = vector.broadcast %cst_36 : f32 to vector<8x1xf32>
      %64 = arith.addf %62, %63 : vector<8x1xf32>
      %65 = arith.addf %57, %60 : vector<8x1xf32>
      %cst_37 = arith.constant 9.99999974E-6 : f32
      %66 = vector.broadcast %cst_37 : f32 to vector<8x1xf32>
      %67 = arith.addf %65, %66 : vector<8x1xf32>
      %68 = arith.divf %64, %67 : vector<8x1xf32>
      %cst_38 = arith.constant 1.000000e+00 : f32
      %69 = vector.broadcast %cst_38 : f32 to vector<8x1xf32>
      %70 = arith.subf %69, %68 : vector<8x1xf32>
      %c0_39 = arith.constant 0 : index
      %c0_40 = arith.constant 0 : index
      %71 = vector.load %arg4[%c0_39, %c0_40] : memref<8x1xf32, #tpu.memory_space<vmem>>, vector<8x1xf32>
      tpu.vector_store %arg4[%c0_39, %c0_40], %70 {strides = array<i32>} : memref<8x1xf32, #tpu.memory_space<vmem>>, vector<8x1xf32>,
      %c0_41 = arith.constant 0 : index
      %c0_42 = arith.constant 0 : index
      %72 = vector.load %arg9[%c0_41, %c0_42] : memref<8x128xf32, #tpu.memory_space<vmem>>, vector<8x128xf32>
      %cst_43 = arith.constant dense<0.000000e+00> : vector<8xf32>
      %73 = vector.multi_reduction <add>, %72, %cst_43 [1] : vector<8x128xf32> to vector<8xf32>
      %74 = vector.shape_cast %73 : vector<8xf32> to vector<8x1xf32>
      %c0_44 = arith.constant 0 : index
      %c0_45 = arith.constant 0 : index
      %75 = vector.load %arg5[%c0_44, %c0_45] : memref<8x1xf32, #tpu.memory_space<vmem>>, vector<8x1xf32>
      tpu.vector_store %arg5[%c0_44, %c0_45], %74 {strides = array<i32>} : memref<8x1xf32, #tpu.memory_space<vmem>>, vector<8x1xf32>,
    } else {
    }
    return
  }
  func.func @transform_0(%arg0: i32, %arg1: i32) -> (i32, i32) {
    %c0_i32 = arith.constant 0 : i32
    return %arg0, %arg1 : i32, i32
  }
  func.func @transform_1(%arg0: i32, %arg1: i32) -> (i32, i32) {
    %c0_i32 = arith.constant 0 : i32
    return %arg0, %arg1 : i32, i32
  }
  func.func @transform_2(%arg0: i32, %arg1: i32) -> (i32, i32) {
    %c0_i32 = arith.constant 0 : i32
    %c0_i32_0 = arith.constant 0 : i32
    return %arg0, %c0_i32 : i32, i32
  }
  func.func @transform_3(%arg0: i32, %arg1: i32) -> (i32, i32) {
    %c0_i32 = arith.constant 0 : i32
    %c0_i32_0 = arith.constant 0 : i32
    return %arg0, %c0_i32 : i32, i32
  }
}

</mosaic_0001>

<bundles_post_ra>
// kernel: tpu_custom_call.1
= control target key start
LH: loop header
LB: loop body
LE: loop exit
PB: predicated region body
PF: predicated region fallthrough
CT: control target
= control target key end

     0   :  { %9 = vsyncpa [#allocation7], 0  ;;  %s267_s0 = inlined_call_operand.hbm [shape: f32[8,256], index: 0, kind: input, shape index: {}]   ;;  %s268_s1 = inlined_call_operand.hbm [shape: s8[8,256], index: 1, kind: input, shape index: {}]   ;;  %s269_s2 = inlined_call_operand.vmem [shape: f32[8,1], index: 2, kind: output, shape index: {0}]   ;;  %s270_s3 = inlined_call_operand.vmem [shape: f32[8,1], index: 3, kind: output, shape index: {1}]  }
   0x1   :  { %10 = vsyncpa [#allocation9], 0  ;;  %s215_s12 = smov [#allocation6]   ;;  %s216_s14 = smov [#allocation8]  }
   0x2   :  { %s17_s13 = sshll.u32 %s215_s12, 4  ;;  %s27_s15 = sshll.u32 %s216_s14, 4  ;;  %s18_s13 = int_to_ptr.vmem [resolvable:$true] %s17_s13  ;;  %s28_s15 = int_to_ptr.vmem [resolvable:$true] %s27_s15 }
   0x3   :  { %s167_s18 = scalar_lea.hbm %s267_s0, 256 }
   0x4   :  { %p168_p0 = scmp.ne.s32.totalorder %s267_s0, %s167_s18  ;;  %p171_p1 = scmp.lt.u32.totalorder %s167_s18, %s267_s0 }
   0x6   :  { %p173_p2 = pnand %p171_p1, %p168_p0 }
   0x8   :  { %176 = shalt.err (!%p173_p2)
}
   0x9   :  { %s177_s23 = scalar_lea.vmem %s18_s13, 256  ;;  %p182_p4 = scmp.lt.s32.totalorder %s18_s13, %s18_s13 }
   0xa   :  { %p178_p3 = scmp.ne.s32.totalorder %s18_s13, %s177_s23  ;;  %p183_p5 = scmp.lt.s32.totalorder %s177_s23, %s177_s23 }
   0xc   :  { %p184_p6 = por %p183_p5, %p182_p4 }
   0xe   :  { %p185_p7 = pnand %p184_p6, %p178_p3 }
  0x10   :  { %188 = shalt.err (!%p185_p7)
}
  0x11   :  { %20 = dma.hbm_to_vmem [thread:$0]  %s267_s0, 256, %s18_s13, [#allocation7]  }
  0x12   :  { %s189_s28 = scalar_lea.hbm %s268_s1, 64 }
  0x13   :  { %p190_p8 = scmp.ne.s32.totalorder %s268_s1, %s189_s28  ;;  %p193_p9 = scmp.lt.u32.totalorder %s189_s28, %s268_s1 }
  0x15   :  { %p195_p10 = pnand %p193_p9, %p190_p8 }
  0x17   :  { %198 = shalt.err (!%p195_p10)
}
  0x18   :  { %s199_s6 = scalar_lea.vmem %s28_s15, 64  ;;  %p204_p12 = scmp.lt.s32.totalorder %s28_s15, %s28_s15 }
  0x19   :  { %p200_p11 = scmp.ne.s32.totalorder %s28_s15, %s199_s6  ;;  %p205_p13 = scmp.lt.s32.totalorder %s199_s6, %s199_s6 }
  0x1b   :  { %p206_p0 = por %p205_p13, %p204_p12 }
  0x1d   :  { %p207_p1 = pnand %p206_p0, %p200_p11 }
  0x1f   :  { %210 = shalt.err (!%p207_p1)
}
  0x20   :  { %30 = dma.hbm_to_vmem [thread:$0]  %s268_s1, 64, %s28_s15, [#allocation9]  }
  0x21   :  { %211 = dma.done.wait [#allocation7], 256  }
  0x22   :  { %212 = vsyncadd [#allocation7], 4294967040 }
  0x23   :  { %213 = dma.done.wait [#allocation9], 64  }
  0x24   :  { %214 = vsyncadd [#allocation9], 4294967232  ;;  %v45_v0 = vld [vmem:[#allocation6] sm:$0xff]  ;;  %v46_v1 = vld [vmem:[#allocation6 + $0x8] sm:$0xff]  ;;  %vm135_vm4 = vcmask 7168  }
  0x25   :  { %v52_v2 = vand.u32 2147483647, %v45_v0  ;;  %v53_v3 = vand.u32 2147483647, %v46_v1  ;;  %v47_v12 = vld [vmem:[#allocation8] sm:$0xf] }
  0x26   :  { %v48_v13 = vunpack.c.0.s8 %v47_v12  ;;  %v49_v14 = vunpack.c.1.s8 %v47_v12  ;;  %v72_v20 = vmax.f32 %v45_v0, 0.0  ;;  %v73_v24 = vmax.f32 %v46_v1, 0.0 }
  0x27   :  { %v54_v4 = vsub.f32 0.0, %v52_v2  ;;  %v55_v5 = vsub.f32 0.0, %v53_v3  ;;  %vm66_vm0 = vcmp.ge.f32.partialorder %v45_v0, 0.0  ;;  %vm67_vm1 = vcmp.ge.f32.partialorder %v46_v1, 0.0 }
  0x28   :  { %v50_v17 = vcvt.s32.f32 %v48_v13  ;;  %v51_v18 = vcvt.s32.f32 %v49_v14 }
  0x29   :  { %v56_v6 = vmul.f32 1.442695, %v54_v4  ;;  %v58_v7 = vmul.f32 1.442695, %v55_v5 }
  0x2a   :  { %v74_v21 = vmul.f32 %v50_v17, %v45_v0  ;;  %v75_v25 = vmul.f32 %v51_v18, %v46_v1  ;;  %v109_v47 = vadd.f32 %v51_v18, %v50_v17 }
  0x2b   :  { %153 = vpow2.f32 %v56_v6 }
  0x2c   :  { %155 = vpow2.f32 %v58_v7  ;;  %v76_v33 = vsub.f32 %v72_v20, %v74_v21  ;;  %v77_v37 = vsub.f32 %v73_v24, %v75_v25 }
  0x35   :  { %v154_v8 = vpop.eup %153 }
  0x36   :  { %v156_v9 = vpop.eup %155  ;;  %v60_v10 = vadd.f32 1.0, %v154_v8  ;;  %v81_v15 = vmul.f32 -0.5, %v154_v8  ;;  %v84_v22 = vand.u32 2147483647, %v154_v8 }
  0x37   :  { %v61_v11 = vadd.f32 1.0, %v156_v9  ;;  %v90_v16 = vmul.f32 -0.5, %v156_v9  ;;  %v93_v26 = vand.u32 2147483647, %v156_v9 }
  0x38   :  { %157 = vrcp.f32 %v60_v10  ;;  %v82_v19 = vadd.f32 1.0, %v81_v15  ;;  %vm85_vm2 = vcmp.lt.f32.partialorder %v84_v22, 0.0004427343 }
  0x39   :  { %159 = vrcp.f32 %v61_v11  ;;  %v91_v23 = vadd.f32 1.0, %v90_v16  ;;  %vm94_vm3 = vcmp.lt.f32.partialorder %v93_v26, 0.0004427343 }
  0x3a   :  { %161 = vlog2.f32 %v60_v10  ;;  %v83_v30 = vmul.f32 %v154_v8, %v82_v19 }
  0x3b   :  { %163 = vlog2.f32 %v61_v11  ;;  %v92_v34 = vmul.f32 %v156_v9, %v91_v23 }
  0x42   :  { %v158_v27 = vpop.eup %157 }
  0x43   :  { %v160_v28 = vpop.eup %159  ;;  %v68_v29 = vmul.f32 %v158_v27, %v154_v8 }
  0x44   :  { %v162_v31 = vpop.eup %161  ;;  %v69_v32 = vmul.f32 %v160_v28, %v156_v9 }
  0x45   :  { %v164_v35 = vpop.eup %163  ;;  %v70_v36 = vsel %vm66_vm0, %v158_v27, %v68_v29  ;;  %v80_v38 = vmul.f32 0.6931472, %v162_v31 }
  0x46   :  { %v71_v39 = vsel %vm67_vm1, %v160_v28, %v69_v32  ;;  %v99_v40 = vmul.f32 %v70_v36, %v50_v17  ;;  %v89_v41 = vmul.f32 0.6931472, %v164_v35 }
  0x47   :  { %v105_v42 = vadd.f32 %v71_v39, %v70_v36  ;;  %v100_v43 = vmul.f32 %v71_v39, %v51_v18  ;;  %v86_v44 = vsel %vm85_vm2, %v83_v30, %v80_v38 }
  0x48   :  { %v95_v45 = vsel %vm94_vm3, %v92_v34, %v89_v41  ;;  %v96_v46 = vadd.f32 %v86_v44, %v76_v33 }
  0x49   :  { %123 = vadd.xlane.f32.xlu0 %v105_v42  ;;  %v101_v48 = vadd.f32 %v100_v43, %v99_v40  ;;  %v97_v49 = vadd.f32 %v95_v45, %v77_v37 }
  0x4b   :  { %120 = vadd.xlane.f32.xlu1 %v101_v48  ;;  %v113_v50 = vadd.f32 %v97_v49, %v96_v46 }
  0x4d   :  { %126 = vadd.xlane.f32.xlu0 %v109_v47 }
  0x4f   :  { %138 = vadd.xlane.f32.xlu1 %v113_v50 }
  0xd6   :  { %v124_v51 = vpop.xlane.xlu0 %123 }
  0xd8   :  { %v121_v52 = vpop.xlane.xlu1 %120 }
  0xd9   :  { %v128_v57 = vmul.f32 2.0, %v121_v52 }
  0xda   :  { %v127_v53 = vpop.xlane.xlu0 %126 }
  0xdb   :  { %v130_v54 = vadd.f32 %v127_v53, %v124_v51  ;;  %v129_v58 = vadd.f32 1e-05, %v128_v57 }
  0xdc   :  { %v139_v55 = vpop.xlane.xlu1 %138 }
  0xdd   :  { %v131_v56 = vadd.f32 1e-05, %v130_v54  ;;  %140 = vst.msk [vmem:[%s270_s3] sm:$0xff] %vm135_vm4, %v139_v55 }
  0xdf   :  { %165 = vrcp.f32 %v131_v56 }
  0xe9   :  { %v166_v59 = vpop.eup %165 }
  0xea   :  { %v133_v60 = vmul.f32 %v166_v59, %v129_v58 }
  0xec   :  { %v134_v61 = vsub.f32 1.0, %v133_v60 }
  0xee   :  { %136 = vst.msk [vmem:[%s269_s2] sm:$0xff] %vm135_vm4, %v134_v61 }
  0xef   :  { %149 = vsyncpa [#allocation7], 1 }
  0xf0   :  { %150 = vsyncpa [#allocation9], 1 }

</bundles_post_ra>
